<compile_context>
chip_gen: v7x
topology: tpu7x:2x2x1
jax: 0.10.0
libtpu: 0.0.40
codegen_flags: <defaults>
</compile_context>

<pallas_src>
import functools

import jax
import jax.numpy as jnp
from jax import lax
from jax.experimental import pallas as pl
from jax.experimental.pallas import tpu as pltpu

_LANE = 128


def _normal_loss_kernel(f_ref, r_ref, out_ref, acc_ref, *,
                        n_channels, n_vectors, tile_g, tiles_per_core):
    """Accumulates per-vector cosine similarities.

    f_ref / r_ref: (tile_g, n_channels*128) channel-interleaved rows; row g holds
    128 complete C-vectors (vector j occupies lanes [C*j, C*j + C)).
    """
    C = n_channels
    L = C * _LANE
    core = pl.program_id(0)
    t = pl.program_id(1)

    @pl.when(t == 0)
    def _():
        acc_ref[...] = jnp.zeros_like(acc_ref)

    f = f_ref[...].astype(jnp.float32)
    r = r_ref[...].astype(jnp.float32)

    # Elementwise products, then grouped sums over the C interleaved channels:
    # after the rolls, lane C*j holds sum_{ch} x[C*j + ch].  The shifts stay inside
    # a row for the kept lanes; the circular wrap only touches discarded lanes.
    p, ff, rr = f * r, f * f, r * r

    def grouped(x):
        s = x
        for k in range(1, C):
            s = s + jnp.roll(x, -k, axis=1)
        return s

    pg, ffg, rrg = grouped(p), grouped(ff), grouped(rr)

    # One rsqrt per norm (EUP) rather than rsqrt(ff*rr): avoids f32 underflow of the
    # product and matches prod / (|fake| * |real|) of the reference module (no
    # epsilon, exactly like the PyTorch code: zero-norm rows still give inf/nan).
    cos = pg * (lax.rsqrt(ffg) * lax.rsqrt(rrg))

    # Lane mask for complete vectors: lane % C == 0, built with exact f32 arithmetic
    # (no vector integer div/mod) and broadcast along sublanes before the compare.
    lane_idx = lax.broadcasted_iota(jnp.int32, (1, L), 1)
    lane_f = lane_idx.astype(jnp.float32)
    q = jnp.floor(lane_f * (1.0 / C))
    ch_rem = jnp.broadcast_to(lane_f - q * C, cos.shape)
    ch_ok = ch_rem < 0.5

    # Block position in units of 128-vector group rows.
    g0 = (core * tiles_per_core + t) * tile_g
    full_groups = n_vectors // _LANE      # group rows fully populated with real data
    tail = n_vectors % _LANE              # vectors in the last partial group row

    all_valid = (g0 + tile_g) <= full_groups

    @pl.when(all_valid)
    def _():
        # Interior block: every row holds real vectors; only the lane mask applies.
        acc_ref[...] += jnp.where(ch_ok, cos, 0.0)

    @pl.when(jnp.logical_not(all_valid))
    def _():
        # Boundary (or clamped redundant) block: additionally mask rows/lanes past
        # the last real vector.  Covers zero-padded rows (rsqrt(0) = inf -> NaN is
        # discarded by the select) and out-of-bounds garbage of a ragged last tile.
        row = lax.broadcasted_iota(jnp.int32, (tile_g, L), 0)
        lane = lax.broadcasted_iota(jnp.int32, (tile_g, L), 1)
        grow = g0 + row
        row_ok = (grow < full_groups) | ((grow == full_groups) & (lane < C * tail))
        acc_ref[...] += jnp.where(ch_ok & row_ok, cos, 0.0)

    @pl.when(t == pl.num_programs(1) - 1)
    def _():
        # One cross-sublane reduce per core at the very end -> (1, L) partials.
        out_ref[...] = jnp.sum(acc_ref[...], axis=0, keepdims=True)


def _default_num_cores():
    """2 on dual-TensorCore chips (v7x), else 1.  Best-effort, never raises."""
    try:
        kind = jax.devices()[0].device_kind.lower()
    except Exception:
        return 1
    return 2 if ("v7" in kind or "7x" in kind) else 1


def normal_loss(grad_fake, grad_real, *, tile_g=None, num_cores=None):
    """1 - mean(cosine_similarity(grad_fake, grad_real, dim=-1)) over all (B, N)."""
    B, N, C = grad_fake.shape
    assert grad_real.shape == grad_fake.shape
    M = B * N                      # number of C-vectors
    L = C * _LANE                  # lanes per 128-vector group row

    f2 = grad_fake.reshape(M, C)
    r2 = grad_real.reshape(M, C)

    # Row-pad to a multiple of 128 vectors (<= 127 rows) only when needed; for the
    # common M % 128 == 0 case the inputs reach the kernel with ZERO copies
    # (reshapes of contiguous arrays are free).
    # TODO(synk): have the producer emit M as a multiple of 128 (or a [C, M] layout)
    # so even this small pad copy never triggers.
    G = pl.cdiv(M, _LANE)
    if M % _LANE != 0:
        pad = G * _LANE - M
        f2 = jnp.pad(f2, ((0, pad), (0, 0)))
        r2 = jnp.pad(r2, ((0, pad), (0, 0)))

    f = f2.reshape(G, L)           # free reshape: channel-interleaved group rows
    r = r2.reshape(G, L)

    itemsize = grad_fake.dtype.itemsize
    if tile_g is None:
        # ~2 MiB per input block (past the ~1 MiB needed for ~85%+ of HBM roofline);
        # 2 inputs x 2 pipeline buffers + f32 accumulator ~= 10-15 MiB, safely under
        # the 32 MiB scoped-VMEM budget on v5e/v6e/v7x.
        target_bytes = 2 * 1024 * 1024
        tile_g = max(8, (target_bytes // (L * itemsize)) // 8 * 8)
    if tile_g >= G:
        tile_g = G                 # single tile; block == full array dim is legal
    else:
        tile_g = max(8, (tile_g // 8) * 8)

    tiles_total = pl.cdiv(G, tile_g)
    if num_cores is None:
        num_cores = _default_num_cores()
    num_cores = max(1, min(num_cores, tiles_total))
    tiles_per_core = pl.cdiv(tiles_total, num_cores)
    last_block = tiles_total - 1

    kernel = functools.partial(
        _normal_loss_kernel, n_channels=C, n_vectors=M,
        tile_g=tile_g, tiles_per_core=tiles_per_core)

    def in_map(c, t):
        # Clamp redundant trailing steps (when tiles don't split evenly across
        # cores) onto the last real block; the kernel masks their contribution to 0.
        return (jnp.minimum(c * tiles_per_core + t, last_block), 0)

    partials = pl.pallas_call(
        kernel,
        out_shape=jax.ShapeDtypeStruct((num_cores, L), jnp.float32),
        grid_spec=pltpu.PrefetchScalarGridSpec(
            num_scalar_prefetch=0,
            grid=(num_cores, tiles_per_core),
            in_specs=[pl.BlockSpec((tile_g, L), in_map),
                      pl.BlockSpec((tile_g, L), in_map)],
            out_specs=pl.BlockSpec((1, L), lambda c, t: (c, 0)),
            scratch_shapes=[pltpu.VMEM((tile_g, L), jnp.float32)],
        ),
        # TODO(synk): on v7x, verify the leading axis actually shards across the two
        # TensorCores; if not, switch it to pltpu.CORE_PARALLEL (or pl.core_map over
        # pltpu.create_tensorcore_mesh).
        compiler_params=pltpu.CompilerParams(
            dimension_semantics=("parallel", "arbitrary"),
            vmem_limit_bytes=32 * 1024 * 1024),
    )(f, r)

    return 1.0 - jnp.sum(partials) / jnp.float32(M)


def _reference(grad_fake, grad_real):
    prod = jnp.sum(grad_fake * grad_real, axis=-1)
    fake_norm = jnp.sqrt(jnp.sum(grad_fake ** 2, axis=-1))
    real_norm = jnp.sqrt(jnp.sum(grad_real ** 2, axis=-1))
    return 1.0 - jnp.mean(prod / (fake_norm * real_norm))


if __name__ == "__main__":
    base_key = jax.random.PRNGKey(0)

    def check(shape, **kw):
        kf, kr = jax.random.split(jax.random.fold_in(base_key, shape[1]))
        gf = jax.random.normal(kf, shape, dtype=jnp.float32)
        gr = jax.random.normal(kr, shape, dtype=jnp.float32)
        out = jax.block_until_ready(normal_loss(gf, gr, **kw))
        ref = _reference(gf, gr)
        assert jnp.allclose(out, ref, rtol=1e-5, atol=1e-5), (shape, out, ref)
        return out

    # Primary case (matches the PyTorch module's [B, N, 3] normal/gradient vectors).
    check((2, 128, 3))
    # Ragged M (not a multiple of 128): exercises the zero-pad + boundary masking.
    check((2, 100, 3))
    # Multiple tiles, ragged last tile, forced 2-way core split with a clamped
    # redundant grid step.
    check((1, 2560, 3), tile_g=8, num_cores=2)

    # Also verify it composes with jit.
    gf = jax.random.normal(jax.random.PRNGKey(1), (2, 128, 3), dtype=jnp.float32)
    gr = jax.random.normal(jax.random.PRNGKey(2), (2, 128, 3), dtype=jnp.float32)
    out = jax.block_until_ready(jax.jit(normal_loss)(gf, gr))
    assert jnp.allclose(out, _reference(gf, gr), rtol=1e-5, atol=1e-5), out

    print("KERNEL_OK")
</pallas_src>

<mosaic_0001>
module attributes {stable_mosaic.version = 11 : i64} {
  func.func @_normal_loss_kernel(%arg0: i32, %arg1: i32, %arg2: memref<2x384xf32, #tpu.memory_space<vmem>>, %arg3: memref<2x384xf32, #tpu.memory_space<vmem>>, %arg4: memref<1x384xf32, #tpu.memory_space<vmem>>, %arg5: memref<2x384xf32, #tpu.memory_space<vmem>>) attributes {dimension_semantics = [#tpu.dimension_semantics<parallel>, #tpu.dimension_semantics<arbitrary>], iteration_bounds = array<i64: 1, 1>, scalar_prefetch = 0 : i64, scratch_operands = 1 : i64, tpu.core_type = #tpu.core_type<tc>, window_params = [{transform_indices = @transform_0, window_bounds = array<i64: 2, 384>}, {transform_indices = @transform_1, window_bounds = array<i64: 2, 384>}, {transform_indices = @transform_2, window_bounds = array<i64: 1, 384>}]} {
    %c0_i32 = arith.constant 0 : i32
    %0 = arith.cmpi eq, %arg1, %c0_i32 : i32
    %1 = arith.extui %0 : i1 to i32
    %c0_i32_0 = arith.constant 0 : i32
    %2 = arith.cmpi ne, %1, %c0_i32_0 : i32
    scf.if %2 {
      %cst_12 = arith.constant 0.000000e+00 : f32
      %61 = vector.broadcast %cst_12 : f32 to vector<2x384xf32>
      %c0_13 = arith.constant 0 : index
      %c0_14 = arith.constant 0 : index
      %62 = vector.load %arg5[%c0_13, %c0_14] : memref<2x384xf32, #tpu.memory_space<vmem>>, vector<2x384xf32>
      tpu.vector_store %arg5[%c0_13, %c0_14], %61 {strides = array<i32>} : memref<2x384xf32, #tpu.memory_space<vmem>>, vector<2x384xf32>,
    } else {
    }
    %c0 = arith.constant 0 : index
    %c0_1 = arith.constant 0 : index
    %3 = vector.load %arg2[%c0, %c0_1] : memref<2x384xf32, #tpu.memory_space<vmem>>, vector<2x384xf32>
    %c0_2 = arith.constant 0 : index
    %c0_3 = arith.constant 0 : index
    %4 = vector.load %arg3[%c0_2, %c0_3] : memref<2x384xf32, #tpu.memory_space<vmem>>, vector<2x384xf32>
    %5 = arith.mulf %3, %4 : vector<2x384xf32>
    %6 = arith.mulf %3, %3 : vector<2x384xf32>
    %7 = arith.mulf %4, %4 : vector<2x384xf32>
    %8 = vector.extract_strided_slice %5 {offsets = [0, 1], sizes = [2, 383], strides = [1, 1]} : vector<2x384xf32> to vector<2x383xf32>
    %9 = vector.extract_strided_slice %5 {offsets = [0, 0], sizes = [2, 1], strides = [1, 1]} : vector<2x384xf32> to vector<2x1xf32>
    %10 = tpu.concatenate %8, %9 in 1 : vector<2x383xf32>, vector<2x1xf32> -> vector<2x384xf32>
    %11 = arith.addf %5, %10 : vector<2x384xf32>
    %12 = vector.extract_strided_slice %5 {offsets = [0, 2], sizes = [2, 382], strides = [1, 1]} : vector<2x384xf32> to vector<2x382xf32>
    %13 = vector.extract_strided_slice %5 {offsets = [0, 0], sizes = [2, 2], strides = [1, 1]} : vector<2x384xf32> to vector<2x2xf32>
    %14 = tpu.concatenate %12, %13 in 1 : vector<2x382xf32>, vector<2x2xf32> -> vector<2x384xf32>
    %15 = arith.addf %11, %14 : vector<2x384xf32>
    %16 = vector.extract_strided_slice %6 {offsets = [0, 1], sizes = [2, 383], strides = [1, 1]} : vector<2x384xf32> to vector<2x383xf32>
    %17 = vector.extract_strided_slice %6 {offsets = [0, 0], sizes = [2, 1], strides = [1, 1]} : vector<2x384xf32> to vector<2x1xf32>
    %18 = tpu.concatenate %16, %17 in 1 : vector<2x383xf32>, vector<2x1xf32> -> vector<2x384xf32>
    %19 = arith.addf %6, %18 : vector<2x384xf32>
    %20 = vector.extract_strided_slice %6 {offsets = [0, 2], sizes = [2, 382], strides = [1, 1]} : vector<2x384xf32> to vector<2x382xf32>
    %21 = vector.extract_strided_slice %6 {offsets = [0, 0], sizes = [2, 2], strides = [1, 1]} : vector<2x384xf32> to vector<2x2xf32>
    %22 = tpu.concatenate %20, %21 in 1 : vector<2x382xf32>, vector<2x2xf32> -> vector<2x384xf32>
    %23 = arith.addf %19, %22 : vector<2x384xf32>
    %24 = vector.extract_strided_slice %7 {offsets = [0, 1], sizes = [2, 383], strides = [1, 1]} : vector<2x384xf32> to vector<2x383xf32>
    %25 = vector.extract_strided_slice %7 {offsets = [0, 0], sizes = [2, 1], strides = [1, 1]} : vector<2x384xf32> to vector<2x1xf32>
    %26 = tpu.concatenate %24, %25 in 1 : vector<2x383xf32>, vector<2x1xf32> -> vector<2x384xf32>
    %27 = arith.addf %7, %26 : vector<2x384xf32>
    %28 = vector.extract_strided_slice %7 {offsets = [0, 2], sizes = [2, 382], strides = [1, 1]} : vector<2x384xf32> to vector<2x382xf32>
    %29 = vector.extract_strided_slice %7 {offsets = [0, 0], sizes = [2, 2], strides = [1, 1]} : vector<2x384xf32> to vector<2x2xf32>
    %30 = tpu.concatenate %28, %29 in 1 : vector<2x382xf32>, vector<2x2xf32> -> vector<2x384xf32>
    %31 = arith.addf %27, %30 : vector<2x384xf32>
    %32 = math.rsqrt %23 : vector<2x384xf32>
    %33 = math.rsqrt %31 : vector<2x384xf32>
    %34 = arith.mulf %32, %33 : vector<2x384xf32>
    %35 = arith.mulf %15, %34 : vector<2x384xf32>
    %36 = tpu.iota {dimensions = array<i32: 1>} : vector<1x384xi32>
    %37 = arith.sitofp %36 : vector<1x384xi32> to vector<1x384xf32>
    %cst = arith.constant 0.333333343 : f32
    %38 = vector.broadcast %cst : f32 to vector<1x384xf32>
    %39 = arith.mulf %37, %38 : vector<1x384xf32>
    %40 = math.floor %39 : vector<1x384xf32>
    %cst_4 = arith.constant 3.000000e+00 : f32
    %41 = vector.broadcast %cst_4 : f32 to vector<1x384xf32>
    %42 = arith.mulf %40, %41 : vector<1x384xf32>
    %43 = arith.subf %37, %42 : vector<1x384xf32>
    %44 = vector.shape_cast %43 : vector<1x384xf32> to vector<1x384xf32>
    %45 = vector.broadcast %44 : vector<1x384xf32> to vector<2x384xf32>
    %cst_5 = arith.constant 5.000000e-01 : f32
    %46 = vector.broadcast %cst_5 : f32 to vector<2x384xf32>
    %47 = arith.cmpf olt, %45, %46 : vector<2x384xf32>
    %c1_i32 = arith.constant 1 : i32
    %48 = arith.muli %arg0, %c1_i32 : i32
    %49 = arith.addi %48, %arg1 : i32
    %c2_i32 = arith.constant 2 : i32
    %50 = arith.muli %49, %c2_i32 : i32
    %c2_i32_6 = arith.constant 2 : i32
    %51 = arith.addi %50, %c2_i32_6 : i32
    %c2_i32_7 = arith.constant 2 : i32
    %52 = arith.cmpi sle, %51, %c2_i32_7 : i32
    %53 = arith.extui %52 : i1 to i32
    %c0_i32_8 = arith.constant 0 : i32
    %54 = arith.cmpi ne, %53, %c0_i32_8 : i32
    scf.if %54 {
      %c0_12 = arith.constant 0 : index
      %c0_13 = arith.constant 0 : index
      %61 = vector.load %arg5[%c0_12, %c0_13] : memref<2x384xf32, #tpu.memory_space<vmem>>, vector<2x384xf32>
      %cst_14 = arith.constant 0.000000e+00 : f32
      %62 = vector.broadcast %cst_14 : f32 to vector<2x384xf32>
      %63 = arith.select %47, %35, %62 : vector<2x384xi1>, vector<2x384xf32>
      %64 = arith.addf %61, %63 : vector<2x384xf32>
      %c0_15 = arith.constant 0 : index
      %c0_16 = arith.constant 0 : index
      %65 = vector.load %arg5[%c0_15, %c0_16] : memref<2x384xf32, #tpu.memory_space<vmem>>, vector<2x384xf32>
      tpu.vector_store %arg5[%c0_15, %c0_16], %64 {strides = array<i32>} : memref<2x384xf32, #tpu.memory_space<vmem>>, vector<2x384xf32>,
    } else {
    }
    %true = arith.constant true
    %55 = arith.xori %52, %true : i1
    %56 = arith.extui %55 : i1 to i32
    %c0_i32_9 = arith.constant 0 : i32
    %57 = arith.cmpi ne, %56, %c0_i32_9 : i32
    scf.if %57 {
      %61 = tpu.iota {dimensions = array<i32: 0>} : vector<2x384xi32>
      %62 = tpu.iota {dimensions = array<i32: 1>} : vector<2x384xi32>
      %63 = vector.broadcast %50 : i32 to vector<2x384xi32>
      %64 = arith.addi %63, %61 : vector<2x384xi32>
      %c2_i32_12 = arith.constant 2 : i32
      %65 = vector.broadcast %c2_i32_12 : i32 to vector<2x384xi32>
      %66 = arith.cmpi slt, %64, %65 : vector<2x384xi32>
      %c2_i32_13 = arith.constant 2 : i32
      %67 = vector.broadcast %c2_i32_13 : i32 to vector<2x384xi32>
      %68 = arith.cmpi eq, %64, %67 : vector<2x384xi32>
      %c0_i32_14 = arith.constant 0 : i32
      %69 = vector.broadcast %c0_i32_14 : i32 to vector<2x384xi32>
      %70 = arith.cmpi slt, %62, %69 : vector<2x384xi32>
      %71 = arith.andi %68, %70 : vector<2x384xi1>
      %72 = arith.ori %66, %71 : vector<2x384xi1>
      %c0_15 = arith.constant 0 : index
      %c0_16 = arith.constant 0 : index
      %73 = vector.load %arg5[%c0_15, %c0_16] : memref<2x384xf32, #tpu.memory_space<vmem>>, vector<2x384xf32>
      %74 = arith.andi %47, %72 : vector<2x384xi1>
      %cst_17 = arith.constant 0.000000e+00 : f32
      %75 = vector.broadcast %cst_17 : f32 to vector<2x384xf32>
      %76 = arith.select %74, %35, %75 : vector<2x384xi1>, vector<2x384xf32>
      %77 = arith.addf %73, %76 : vector<2x384xf32>
      %c0_18 = arith.constant 0 : index
      %c0_19 = arith.constant 0 : index
      %78 = vector.load %arg5[%c0_18, %c0_19] : memref<2x384xf32, #tpu.memory_space<vmem>>, vector<2x384xf32>
      tpu.vector_store %arg5[%c0_18, %c0_19], %77 {strides = array<i32>} : memref<2x384xf32, #tpu.memory_space<vmem>>, vector<2x384xf32>,
    } else {
    }
    %c0_i32_10 = arith.constant 0 : i32
    %58 = arith.cmpi eq, %arg1, %c0_i32_10 : i32
    %59 = arith.extui %58 : i1 to i32
    %c0_i32_11 = arith.constant 0 : i32
    %60 = arith.cmpi ne, %59, %c0_i32_11 : i32
    scf.if %60 {
      %c0_12 = arith.constant 0 : index
      %c0_13 = arith.constant 0 : index
      %61 = vector.load %arg5[%c0_12, %c0_13] : memref<2x384xf32, #tpu.memory_space<vmem>>, vector<2x384xf32>
      %cst_14 = arith.constant dense<0.000000e+00> : vector<384xf32>
      %62 = vector.multi_reduction <add>, %61, %cst_14 [0] : vector<2x384xf32> to vector<384xf32>
      %63 = vector.shape_cast %62 : vector<384xf32> to vector<1x384xf32>
      %c0_15 = arith.constant 0 : index
      %c0_16 = arith.constant 0 : index
      %64 = vector.load %arg4[%c0_15, %c0_16] : memref<1x384xf32, #tpu.memory_space<vmem>>, vector<1x384xf32>
      tpu.vector_store %arg4[%c0_15, %c0_16], %63 {strides = array<i32>} : memref<1x384xf32, #tpu.memory_space<vmem>>, vector<1x384xf32>,
    } else {
    }
    return
  }
  func.func @transform_0(%arg0: i32, %arg1: i32) -> (i32, i32) {
    %c1_i32 = arith.constant 1 : i32
    %0 = arith.muli %arg0, %c1_i32 : i32
    %1 = arith.addi %0, %arg1 : i32
    %c0_i32 = arith.constant 0 : i32
    %2 = arith.minsi %1, %c0_i32 : i32
    %c0_i32_0 = arith.constant 0 : i32
    %c0_i32_1 = arith.constant 0 : i32
    return %2, %c0_i32_0 : i32, i32
  }
  func.func @transform_1(%arg0: i32, %arg1: i32) -> (i32, i32) {
    %c1_i32 = arith.constant 1 : i32
    %0 = arith.muli %arg0, %c1_i32 : i32
    %1 = arith.addi %0, %arg1 : i32
    %c0_i32 = arith.constant 0 : i32
    %2 = arith.minsi %1, %c0_i32 : i32
    %c0_i32_0 = arith.constant 0 : i32
    %c0_i32_1 = arith.constant 0 : i32
    return %2, %c0_i32_0 : i32, i32
  }
  func.func @transform_2(%arg0: i32, %arg1: i32) -> (i32, i32) {
    %c0_i32 = arith.constant 0 : i32
    %c0_i32_0 = arith.constant 0 : i32
    return %arg0, %c0_i32 : i32, i32
  }
}

</mosaic_0001>

<bundles_post_ra>
// kernel: tpu_custom_call.1
= control target key start
LH: loop header
LB: loop body
LE: loop exit
PB: predicated region body
PF: predicated region fallthrough
CT: control target
= control target key end

     0   :  { %7 = vsyncpa [#allocation4], 0  ;;  %s760_s0 = inlined_call_operand.hbm [shape: f32[2,384], index: 0, kind: input, shape index: {}]   ;;  %s761_s1 = inlined_call_operand.hbm [shape: f32[2,384], index: 1, kind: input, shape index: {}]   ;;  %s762_s2 = inlined_call_operand.hbm [shape: f32[1,384], index: 2, kind: output, shape index: {}]  }
   0x1   :  { %8 = vsyncpa [#allocation7], 0 }
   0x2   :  { %9 = vsyncpa [#allocation5], 0  ;;  %s627_s9 = smov [#allocation3]   ;;  %s628_s11 = smov [#allocation6]  }
   0x3   :  { %s22_s10 = sshll.u32 %s627_s9, 4  ;;  %s38_s12 = sshll.u32 %s628_s11, 4  ;;  %s23_s10 = int_to_ptr.vmem [resolvable:$true] %s22_s10  ;;  %s39_s12 = int_to_ptr.vmem [resolvable:$true] %s38_s12 }
   0x4   :  { %s555_s15 = scalar_lea.hbm %s760_s0, 96 }
   0x5   :  { %p556_p0 = scmp.ne.s32.totalorder %s760_s0, %s555_s15  ;;  %p559_p1 = scmp.lt.u32.totalorder %s555_s15, %s760_s0 }
   0x7   :  { %p561_p2 = pnand %p559_p1, %p556_p0 }
   0x9   :  { %564 = shalt.err (!%p561_p2)
}
   0xa   :  { %s565_s20 = scalar_lea.vmem %s23_s10, 96  ;;  %p570_p4 = scmp.lt.s32.totalorder %s23_s10, %s23_s10 }
   0xb   :  { %p566_p3 = scmp.ne.s32.totalorder %s23_s10, %s565_s20  ;;  %p571_p5 = scmp.lt.s32.totalorder %s565_s20, %s565_s20 }
   0xd   :  { %p572_p6 = por %p571_p5, %p570_p4 }
   0xf   :  { %p573_p7 = pnand %p572_p6, %p566_p3 }
  0x11   :  { %576 = shalt.err (!%p573_p7)
}
  0x12   :  { %25 = dma.hbm_to_vmem [thread:$0]  %s760_s0, 96, %s23_s10, [#allocation4]  }
  0x13   :  { %s577_s25 = scalar_lea.hbm %s761_s1, 96 }
  0x14   :  { %p578_p8 = scmp.ne.s32.totalorder %s761_s1, %s577_s25  ;;  %p581_p9 = scmp.lt.u32.totalorder %s577_s25, %s761_s1 }
  0x16   :  { %p583_p10 = pnand %p581_p9, %p578_p8 }
  0x18   :  { %586 = shalt.err (!%p583_p10)
}
  0x19   :  { %s587_s30 = scalar_lea.vmem %s39_s12, 96  ;;  %p592_p12 = scmp.lt.s32.totalorder %s39_s12, %s39_s12 }
  0x1a   :  { %p588_p11 = scmp.ne.s32.totalorder %s39_s12, %s587_s30  ;;  %p593_p13 = scmp.lt.s32.totalorder %s587_s30, %s587_s30 }
  0x1c   :  { %p594_p0 = por %p593_p13, %p592_p12 }
  0x1e   :  { %p595_p1 = pnand %p594_p0, %p588_p11 }
  0x20   :  { %598 = shalt.err (!%p595_p1)
}
  0x21   :  { %41 = dma.hbm_to_vmem [thread:$0]  %s761_s1, 96, %s39_s12, [#allocation7]  }
  0x22   :  { %621 = dma.done.wait [#allocation4], 96  }
  0x23   :  { %622 = vsyncadd [#allocation4], 4294967200 }
  0x24   :  { %623 = dma.done.wait [#allocation7], 96  }
  0x25   :  { %624 = vsyncadd [#allocation7], 4294967200  ;;  %v69_v0 = vlaneseq  ;;  %v629_v1 = vmov 0.0   ;;  %v630_v2 = vmov 1983009808   ;;  %s631_s1 = smov 127  }
  0x26   :  { %58 = vst [vmem:[#allocation2] sm:$0x3f] %v629_v1  ;;  %v67_v3 = vunpack.c.l.s4 %v630_v2  ;;  %v60_v7 = vld [vmem:[#allocation6] sm:$0x3f]  ;;  %v59_v8 = vld [vmem:[#allocation3] sm:$0x3f] }
  0x27   :  { %v675_v4 = vshrl.u32 %v69_v0, 7  ;;  %v680_v9 = vmul.f32 %v60_v7, %v60_v7  ;;  %v682_v10 = vmul.f32 %v59_v8, %v59_v8  ;;  %s632_s4 = smov 126   ;;  %v694_v19 = vmul.f32 %v60_v7, %v59_v8  ;;  %s634_s5 = smov [#allocation8]  }
  0x28   :  { %v68_v5 = vunpack.c.0.s8 %v67_v3  ;;  %vm87_vm0 = vcmask 1039360   ;;  %vm118_vm1 = vcmask 1031168   ;;  %v709_v43 = vand.u32 127, %v69_v0  ;;  %s528_s6 = sshll.u32 %s634_s5, 4  ;;  %s529_s6 = int_to_ptr.vmem [resolvable:$true] %s528_s6 }
  0x29   :  { %v144_v13 = vcombine.high %v682_v10, %v682_v10  ;;  %v221_v15 = vcombine.high %v680_v9, %v680_v9  ;;  %v65_v22 = vcombine.high %v694_v19, %v694_v19  ;;  %vm468_vm5 = vcmask 1041408   ;;  %s599_s7 = scalar_lea.vmem %s529_s6, 48  ;;  %s603_s8 = scalar_lea.vmem %s529_s6, 64 }
  0x2a   :  { %v678_v6 = vsub.s32 %v68_v5, %v675_v4  ;;  %v303_v59 = vadd.s32 128, %v709_v43  ;;  %v304_v63 = vadd.s32 256, %v709_v43  ;;  %v305_v8 = vcvt.s32.f32 %v709_v43  ;;  %p600_p2 = scmp.ne.s32.totalorder %s529_s6, %s599_s7  ;;  %p604_p3 = scmp.lt.s32.totalorder %s529_s6, %s529_s6 }
  0x2b   :  { %vm519_vm6 = vcmp.lt.s32.totalorder %v69_v0, 384  ;;  %p605_p4 = scmp.lt.s32.totalorder %s603_s8, %s599_s7 }
  0x2c   :  { %v228_v11 = vrot.slane %v680_v9, %v678_v6  ;;  %v151_v12 = vrot.slane %v682_v10, %v678_v6  ;;  %v158_v14 = vrot.slane %v144_v13, %v678_v6  ;;  %v235_v17 = vrot.slane %v221_v15, %v678_v6 }
  0x2d   :  { %v72_v20 = vrot.slane %v694_v19, %v678_v6  ;;  %v79_v23 = vrot.slane %v65_v22, %v678_v6  ;;  %v307_v15 = vcvt.s32.f32 %v304_v63  ;;  %p606_p5 = por %p605_p4, %p604_p3 }
  0x2e   :  { %237 = vrot.lane.b32.xlu1 %v228_v11, %s631_s1  ;;  %160 = vrot.lane.b32.xlu0 %v151_v12, %s631_s1  ;;  %v159_v16 = vcombine.high %v151_v12, %v151_v12  ;;  %v236_v18 = vcombine.high %v228_v11, %v228_v11 }
  0x2f   :  { %v80_v21 = vcombine.high %v72_v20, %v72_v20  ;;  %p607_p6 = pnand %p606_p5, %p600_p2 }
  0x32   :  { %190 = vrot.lane.b32.xlu0 %v151_v12, %s632_s4  ;;  %164 = vrot.lane.b32.xlu1 %v158_v14, %s631_s1 }
  0x36   :  { %162 = vrot.lane.b32.xlu0 %v159_v16, %s631_s1  ;;  %241 = vrot.lane.b32.xlu1 %v235_v17, %s631_s1 }
  0x3a   :  { %239 = vrot.lane.b32.xlu0 %v236_v18, %s631_s1  ;;  %192 = vrot.lane.b32.xlu1 %v159_v16, %s632_s4 }
  0x3e   :  { %194 = vrot.lane.b32.xlu0 %v158_v14, %s632_s4  ;;  %267 = vrot.lane.b32.xlu1 %v228_v11, %s632_s4  ;;  %v306_v14 = vcvt.s32.f32 %v303_v59 }
  0x42   :  { %269 = vrot.lane.b32.xlu0 %v236_v18, %s632_s4  ;;  %271 = vrot.lane.b32.xlu1 %v235_v17, %s632_s4 }
  0x46   :  { %81 = vrot.lane.b32.xlu0 %v72_v20, %s631_s1  ;;  %83 = vrot.lane.b32.xlu1 %v80_v21, %s631_s1 }
  0x4a   :  { %112 = vrot.lane.b32.xlu1 %v72_v20, %s632_s4  ;;  %85 = vrot.lane.b32.xlu0 %v79_v23, %s631_s1  ;;  %v308_v20 = vmul.f32 0.33333334, %v305_v8 }
  0x4e   :  { %116 = vrot.lane.b32.xlu1 %v79_v23, %s632_s4  ;;  %114 = vrot.lane.b32.xlu0 %v80_v21, %s632_s4 }
  0xa0   :  { %v238_v24 = vpop.permute.xlu1 %237  ;;  %v161_v25 = vpop.permute.xlu0 %160 }
  0xa4   :  { %v191_v26 = vpop.permute.xlu0 %190  ;;  %v165_v27 = vpop.permute.xlu1 %164 }
  0xa5   :  { %v170_v35 = vsel %vm87_vm0, %v165_v27, %v161_v25 }
  0xa6   :  { %v186_v40 = vrot.slane %v170_v35, %v678_v6 }
  0xa8   :  { %v163_v28 = vpop.permute.xlu0 %162  ;;  %v242_v29 = vpop.permute.xlu1 %241 }
  0xa9   :  { %v166_v30 = vsel %vm87_vm0, %v161_v25, %v163_v28  ;;  %v167_v31 = vsel %vm87_vm0, %v163_v28, %v165_v27  ;;  %v247_v44 = vsel %vm87_vm0, %v242_v29, %v238_v24  ;;  %v310_v25 = vmul.f32 0.33333334, %v307_v15 }
  0xaa   :  { %v172_v32 = vcombine.low %v166_v30, %v167_v31  ;;  %v263_v51 = vrot.slane %v247_v44, %v678_v6  ;;  %v311_v30 = vfloor.f32 %v308_v20 }
  0xab   :  { %v313_v35 = vfloor.f32 %v310_v25 }
  0xac   :  { %v240_v33 = vpop.permute.xlu0 %239  ;;  %v193_v34 = vpop.permute.xlu1 %192  ;;  %v179_v39 = vrot.slane %v172_v32, %v678_v6 }
  0xad   :  { %v243_v36 = vsel %vm87_vm0, %v238_v24, %v240_v33  ;;  %v244_v37 = vsel %vm87_vm0, %v240_v33, %v242_v29  ;;  %v196_v45 = vsel %vm118_vm1, %v191_v26, %v193_v34  ;;  %v309_v24 = vmul.f32 0.33333334, %v306_v14 }
  0xae   :  { %v249_v38 = vcombine.low %v243_v36, %v244_v37  ;;  %v187_v50 = vcombine.low %v179_v39, %v186_v40  ;;  %v314_v39 = vmul.f32 3.0, %v311_v30 }
  0xb0   :  { %v195_v41 = vpop.permute.xlu0 %194  ;;  %v268_v42 = vpop.permute.xlu1 %267  ;;  %v256_v48 = vrot.slane %v249_v38, %v678_v6  ;;  %v189_v1 = vadd.f32 %v187_v50, %v682_v10 }
  0xb1   :  { %v197_v46 = vsel %vm118_vm1, %v193_v34, %v195_v41  ;;  %v200_v47 = vsel %vm118_vm1, %v195_v41, %v191_v26  ;;  %v312_v34 = vfloor.f32 %v309_v24 }
  0xb2   :  { %v202_v49 = vcombine.low %v196_v45, %v197_v46  ;;  %v216_v53 = vrot.slane %v200_v47, %v678_v6  ;;  %v264_v60 = vcombine.low %v256_v48, %v263_v51  ;;  %v317_v48 = vsub.f32 %v305_v8, %v314_v39 }
  0xb3   :  { %v315_v41 = vmul.f32 3.0, %v312_v34 }
  0xb4   :  { %v209_v52 = vrot.slane %v202_v49, %v678_v6  ;;  %v270_v54 = vpop.permute.xlu0 %269  ;;  %v272_v55 = vpop.permute.xlu1 %271  ;;  %v266_v12 = vadd.f32 %v264_v60, %v680_v9  ;;  %vm320_vm2 = vcmp.lt.f32.partialorder %v317_v48, 0.5 }
  0xb5   :  { %v273_v56 = vsel %vm118_vm1, %v268_v42, %v270_v54  ;;  %v274_v57 = vsel %vm118_vm1, %v270_v54, %v272_v55  ;;  %v277_v58 = vsel %vm118_vm1, %v272_v55, %v268_v42  ;;  %v316_v42 = vmul.f32 3.0, %v313_v35 }
  0xb6   :  { %v217_v61 = vcombine.low %v209_v52, %v216_v53  ;;  %v279_v62 = vcombine.low %v273_v56, %v274_v57  ;;  %v293_v3 = vrot.slane %v277_v58, %v678_v6  ;;  %v318_v49 = vsub.f32 %v306_v14, %v315_v41 }
  0xb7   :  { %v319_v50 = vsub.f32 %v307_v15, %v316_v42 }
  0xb8   :  { %v286_v2 = vrot.slane %v279_v62, %v678_v6  ;;  %v82_v5 = vpop.permute.xlu0 %81  ;;  %v84_v7 = vpop.permute.xlu1 %83  ;;  %v219_v11 = vadd.f32 %v217_v61, %v189_v1  ;;  %vm321_vm3 = vcmp.lt.f32.partialorder %v318_v49, 0.5  ;;  %v330_v61 = vld [vmem:[#allocation2] sm:$0x3f] }
  0xb9   :  { %v88_v10 = vsel %vm87_vm0, %v82_v5, %v84_v7  ;;  %vm322_vm4 = vcmp.lt.f32.partialorder %v319_v50, 0.5 }
  0xba   :  { %v294_v13 = vcombine.low %v286_v2, %v293_v3  ;;  %551 = vrsqrt.f32 %v219_v11 }
  0xbc   :  { %v296_v16 = vadd.f32 %v294_v13, %v266_v12  ;;  %v113_v17 = vpop.permute.xlu1 %112  ;;  %v86_v18 = vpop.permute.xlu0 %85 }
  0xbd   :  { %v89_v21 = vsel %vm87_vm0, %v84_v7, %v86_v18  ;;  %v92_v22 = vsel %vm87_vm0, %v86_v18, %v82_v5 }
  0xbe   :  { %553 = vrsqrt.f32 %v296_v16  ;;  %v94_v23 = vcombine.low %v88_v10, %v89_v21  ;;  %v108_v26 = vrot.slane %v92_v22, %v678_v6  ;;  %v633_v10 = vmov 1966171168  }
  0xbf   :  { %v495_v21 = vunpack.c.l.s4 %v633_v10 }
  0xc0   :  { %v101_v9 = vrot.slane %v94_v23, %v678_v6  ;;  %v117_v27 = vpop.permute.xlu1 %116  ;;  %v115_v28 = vpop.permute.xlu0 %114 }
  0xc1   :  { %v123_v29 = vsel %vm118_vm1, %v117_v27, %v113_v17  ;;  %v119_v31 = vsel %vm118_vm1, %v113_v17, %v115_v28  ;;  %v120_v32 = vsel %vm118_vm1, %v115_v28, %v117_v27 }
  0xc2   :  { %v109_v33 = vcombine.low %v101_v9, %v108_v26  ;;  %v125_v36 = vcombine.low %v119_v31, %v120_v32  ;;  %v139_v37 = vrot.slane %v123_v29, %v678_v6 }
  0xc4   :  { %v132_v38 = vrot.slane %v125_v36, %v678_v6  ;;  %v111_v40 = vadd.f32 %v109_v33, %v694_v19  ;;  %v552_v44 = vpop.eup %551 }
  0xc6   :  { %v140_v43 = vcombine.low %v132_v38, %v139_v37 }
  0xc8   :  { %v554_v45 = vpop.eup %553  ;;  %v142_v46 = vadd.f32 %v140_v43, %v111_v40 }
  0xc9   :  { %v299_v47 = vmul.f32 %v554_v45, %v552_v44 }
  0xcb   :  { %v300_v51 = vmul.f32 %v299_v47, %v142_v46 }
  0xcd   :  { %v332_v52 = vcombine.high %v300_v51, %v300_v51  ;;  %v339_v53 = vrot.slane %v300_v51, %v678_v6 }
  0xcf   :  { %v346_v54 = vrot.slane %v332_v52, %v678_v6  ;;  %v347_v19 = vcombine.high %v339_v53, %v339_v53  ;;  %v351_v55 = vsel %vm320_vm2, %v339_v53, 0.0 }
  0xd1   :  { %v352_v56 = vsel %vm321_vm3, %v347_v19, 0.0  ;;  %v353_v57 = vsel %vm322_vm4, %v346_v54, 0.0 }
  0xd2   :  { %v357_v58 = vcombine.low %v351_v55, %v352_v56  ;;  %v371_v60 = vrot.slane %v353_v57, %v678_v6 }
  0xd4   :  { %v364_v59 = vrot.slane %v357_v58, %v678_v6 }
  0xd6   :  { %v372_v62 = vcombine.low %v364_v59, %v371_v60 }
  0xd8   :  { %v374_v63 = vadd.f32 %v372_v62, %v330_v61 }
  0xda   :  { %375 = vst [vmem:[#allocation2] sm:$0x3f] %v374_v63 }
  0xe1   :  { %v447_v1 = vld [vmem:[#allocation2] sm:$0x3f] }
  0xe2   :  { %v449_v2 = vcombine.high %v447_v1, %v447_v1  ;;  %v456_v3 = vrot.slane %v447_v1, %v678_v6 }
  0xe4   :  { %v463_v5 = vrot.slane %v449_v2, %v678_v6  ;;  %v464_v7 = vcombine.high %v456_v3, %v456_v3  ;;  %v469_v8 = vsel %vm468_vm5, %v456_v3, 0.0  ;;  %v496_v6 = vunpack.c.0.s8 %v495_v21 }
  0xe5   :  { %v470_v11 = vrot.slane %v469_v8, 4 }
  0xe6   :  { %v476_v12 = vsel %vm468_vm5, %v464_v7, 0.0  ;;  %v483_v13 = vsel %vm468_vm5, %v463_v5, 0.0  ;;  %v499_v32 = vsub.s32 %v496_v6, %v675_v4 }
  0xe7   :  { %v471_v14 = vadd.f32 %v470_v11, %v469_v8  ;;  %v477_v15 = vrot.slane %v476_v12, 4  ;;  %v484_v16 = vrot.slane %v483_v13, 4 }
  0xe9   :  { %v472_v17 = vrot.slane %v471_v14, 2  ;;  %v478_v18 = vadd.f32 %v477_v15, %v476_v12  ;;  %v485_v20 = vadd.f32 %v484_v16, %v483_v13 }
  0xeb   :  { %v473_v22 = vadd.f32 %v472_v17, %v471_v14  ;;  %v479_v23 = vrot.slane %v478_v18, 2  ;;  %v486_v24 = vrot.slane %v485_v20, 2 }
  0xed   :  { %v474_v25 = vrot.slane %v473_v22, 1  ;;  %v480_v9 = vadd.f32 %v479_v23, %v478_v18  ;;  %v487_v26 = vadd.f32 %v486_v24, %v485_v20 }
  0xef   :  { %v481_v27 = vrot.slane %v480_v9, 1  ;;  %v488_v28 = vrot.slane %v487_v26, 1  ;;  %v475_v29 = vadd.f32 %v474_v25, %v473_v22 }
  0xf1   :  { %v482_v30 = vadd.f32 %v481_v27, %v480_v9  ;;  %v489_v31 = vadd.f32 %v488_v28, %v487_v26 }
  0xf3   :  { %v493_v33 = vcombine.low %v475_v29, %v482_v30  ;;  %v507_v35 = vrot.slane %v489_v31, %v499_v32 }
  0xf5   :  { %v500_v34 = vrot.slane %v493_v33, %v499_v32 }
  0xf7   :  { %v508_v36 = vcombine.low %v500_v34, %v507_v35 }
  0xf9   :  { %v515_v37 = vrot.slane %v508_v36, %v499_v32 }
  0xfb   :  { %521 = vst.msk [vmem:[#allocation8] sm:$0x7] %vm519_vm6, %v515_v37 }
  0xfc   :  { %610 = shalt.err (!%p607_p6)
}
  0xfd   :  { %s611_s11 = scalar_lea.hbm %s762_s2, 48 }
  0xfe   :  { %p612_p7 = scmp.ne.s32.totalorder %s762_s2, %s611_s11  ;;  %p615_p8 = scmp.lt.u32.totalorder %s611_s11, %s762_s2 }
 0x100   :  { %p617_p9 = pnand %p615_p8, %p612_p7 }
 0x102   :  { %620 = shalt.err (!%p617_p9)
}
 0x103   :  { %531 = dma.vmem_to_hbm [thread:$0]  %s529_s6, 48, %s762_s2, [#allocation5]  }
 0x104   :  { %625 = dma.done.wait [#allocation5], 48  }
 0x105   :  { %626 = vsyncadd [#allocation5], 4294967248 }
 0x106   :  { %535 = vsyncpa [#allocation4], 1 }
 0x107   :  { %536 = vsyncpa [#allocation7], 1 }
 0x108   :  { %537 = vsyncpa [#allocation5], 1 }

</bundles_post_ra>
